<compile_context>
chip_gen: v5e
topology: v5e:2x2
jax: 0.10.0
libtpu: 0.0.40
codegen_flags: <defaults>
</compile_context>

<pallas_src>
import functools

import jax
import jax.numpy as jnp
from jax import lax
from jax.experimental import pallas as pl
from jax.experimental.pallas import tpu as pltpu

V = 33          # ESM tokenizer vocab used by the PyTorch model
VP = 128        # vocab padded to one full 128-lane tile
NEG = -1e9      # bias for padded logit lanes -> ~zero probability, never argmax'd


# ----------------------------------------------------------------------------
# shared in-kernel helper: log_softmax + probs (padded lanes carry -1e9 logits)
# ----------------------------------------------------------------------------
def _log_softmax(logits):
    m = jnp.max(logits, axis=-1, keepdims=True)
    e = jnp.exp(logits - m)
    s = jnp.sum(e, axis=-1, keepdims=True)
    logp = logits - (jnp.log(s) + m)
    probs = e / s
    return logp, probs


# ----------------------------------------------------------------------------
# MemoPiFold head kernel (structure-encoder readout), tiled over token rows
# ----------------------------------------------------------------------------
def _pifold_head_kernel(hv_ref, w0_ref, b0_ref, w1_ref, b1_ref,
                        emb_ref, logp_ref, probs_ref):
    h = jnp.dot(hv_ref[...].astype(jnp.bfloat16), w0_ref[...],
                preferred_element_type=jnp.float32) + b0_ref[...]
    h = jnp.maximum(h, 0.0)
    emb_ref[...] = h
    logits = jnp.dot(h.astype(jnp.bfloat16), w1_ref[...],
                     preferred_element_type=jnp.float32) + b1_ref[...]
    logp, probs = _log_softmax(logits)
    logp_ref[...] = logp
    probs_ref[...] = probs


def memo_pifold_forward(h_V, p, block_rows=256):
    # TODO(synk): the real MemoPiFold_model is a GNN over (h_V, h_E, E_idx); only its
    # node-feature readout head (MLP -> vocab logits -> log_softmax) is represented.
    T, Dd = h_V.shape
    TM = min(block_rows, T)
    assert T % TM == 0
    return pl.pallas_call(
        _pifold_head_kernel,
        out_shape=(jax.ShapeDtypeStruct((T, Dd), jnp.float32),   # embeds
                   jax.ShapeDtypeStruct((T, VP), jnp.float32),   # log_probs (padded)
                   jax.ShapeDtypeStruct((T, VP), jnp.float32)),  # probs (padded)
        grid=(T // TM,),
        in_specs=[
            pl.BlockSpec((TM, Dd), lambda i: (i, 0)),
            pl.BlockSpec((Dd, Dd), lambda i: (0, 0)),
            pl.BlockSpec((1, Dd), lambda i: (0, 0)),
            pl.BlockSpec((Dd, VP), lambda i: (0, 0)),
            pl.BlockSpec((1, VP), lambda i: (0, 0)),
        ],
        out_specs=(
            pl.BlockSpec((TM, Dd), lambda i: (i, 0)),
            pl.BlockSpec((TM, VP), lambda i: (i, 0)),
            pl.BlockSpec((TM, VP), lambda i: (i, 0)),
        ),
        compiler_params=pltpu.CompilerParams(dimension_semantics=("parallel",)),
    )(h_V, p["w0"], p["b0"], p["w1"], p["b1"])


# ----------------------------------------------------------------------------
# Fused per-recycle kernel: get_MSA sampling + (folded) MemoESM + MemoTuning MLP
# ----------------------------------------------------------------------------
def _recycle_kernel(gumbel_ref, probs_ref, des_ref, tw_ref,
                    w1d_ref, b1_ref, w2_ref, b2_ref, wout_ref, bout_ref,
                    emb_ref, logp_ref, probs_out_ref, *, msa_n, inv_temp):
    TM, Vp = probs_ref.shape
    lane = lax.broadcasted_iota(jnp.int32, (TM, Vp), 1)
    valid = lane < V

    # get_MSA: log softmax(probs / temperature), padded lanes excluded
    scaled = jnp.where(valid, probs_ref[...] * inv_temp, NEG)
    m = jnp.max(scaled, axis=-1, keepdims=True)
    lse = jnp.log(jnp.sum(jnp.exp(scaled - m), axis=-1, keepdims=True)) + m
    logp_t = scaled - lse

    # Gumbel-max categorical sampling (== torch.multinomial in distribution);
    # static unroll keeps only one (TM, Vp) score block live per MSA member.
    counts = jnp.zeros((TM, Vp), jnp.float32)
    for mi in range(msa_n):
        scores = logp_t + gumbel_ref[mi]
        smax = jnp.max(scores, axis=-1, keepdims=True)
        pred = jnp.min(jnp.where(scores >= smax, lane, Vp), axis=-1, keepdims=True)
        counts = counts + (lane == pred).astype(jnp.float32)

    # MemoESM embedding + MSA mean, folded: (counts / msa_n) @ (esm_table @ w1e)
    esm_feat = jnp.dot((counts * (1.0 / msa_n)).astype(jnp.bfloat16), tw_ref[...],
                       preferred_element_type=jnp.float32)

    # MemoTuning: fused 2-layer MLP + vocab head + log_softmax
    z = (jnp.dot(des_ref[...].astype(jnp.bfloat16), w1d_ref[...],
                 preferred_element_type=jnp.float32) + esm_feat + b1_ref[...])
    h1 = jnp.maximum(z, 0.0)
    h2 = jnp.maximum(
        jnp.dot(h1.astype(jnp.bfloat16), w2_ref[...],
                preferred_element_type=jnp.float32) + b2_ref[...], 0.0)
    emb_ref[...] = h2
    logits = jnp.dot(h2.astype(jnp.bfloat16), wout_ref[...],
                     preferred_element_type=jnp.float32) + bout_ref[...]
    logp, probs = _log_softmax(logits)
    logp_ref[...] = logp
    probs_out_ref[...] = probs


def recycle_forward(gumbel, probs_prev, des_embeds, tw, p, msa_n, temperature,
                    block_rows=256):
    # TODO(synk): graph message passing over (h_E, E_idx, batch_id), the pretrained ESM
    # transformer, and inference-time tunning dropout are omitted; the per-node
    # sampling + embedding + MLP refinement chain is kept.
    T, Dd = des_embeds.shape
    Dt = p["w2"].shape[0]
    TM = min(block_rows, T)
    assert T % TM == 0
    kernel = functools.partial(_recycle_kernel, msa_n=msa_n,
                               inv_temp=1.0 / float(temperature))
    return pl.pallas_call(
        kernel,
        out_shape=(jax.ShapeDtypeStruct((T, Dt), jnp.float32),   # embeds
                   jax.ShapeDtypeStruct((T, VP), jnp.float32),   # log_probs (padded)
                   jax.ShapeDtypeStruct((T, VP), jnp.float32)),  # probs (padded)
        grid=(T // TM,),
        in_specs=[
            pl.BlockSpec((msa_n, TM, VP), lambda i: (0, i, 0)),  # gumbel noise
            pl.BlockSpec((TM, VP), lambda i: (i, 0)),            # previous probs
            pl.BlockSpec((TM, Dd), lambda i: (i, 0)),            # design embeds
            pl.BlockSpec((VP, Dt), lambda i: (0, 0)),            # esm_table @ w1e
            pl.BlockSpec((Dd, Dt), lambda i: (0, 0)),
            pl.BlockSpec((1, Dt), lambda i: (0, 0)),
            pl.BlockSpec((Dt, Dt), lambda i: (0, 0)),
            pl.BlockSpec((1, Dt), lambda i: (0, 0)),
            pl.BlockSpec((Dt, VP), lambda i: (0, 0)),
            pl.BlockSpec((1, VP), lambda i: (0, 0)),
        ],
        out_specs=(
            pl.BlockSpec((TM, Dt), lambda i: (i, 0)),
            pl.BlockSpec((TM, VP), lambda i: (i, 0)),
            pl.BlockSpec((TM, VP), lambda i: (i, 0)),
        ),
        compiler_params=pltpu.CompilerParams(dimension_semantics=("parallel",)),
    )(gumbel, probs_prev, des_embeds, tw,
      p["w1d"], p["b1"], p["w2"], p["b2"], p["wout"], p["bout"])


# ----------------------------------------------------------------------------
# Final aggregation kernel: per-token first-argmax of confidence over recycles,
# gather that recycle's log_probs row.  Confidence == max-prob, recomputed here
# from probs so no 1-lane conf tensors are ever stored.
# ----------------------------------------------------------------------------
def _aggregate_kernel(probs_ref, logp_ref, out_ref):
    R = probs_ref.shape[0]
    confs = [jnp.max(probs_ref[r], axis=-1, keepdims=True) for r in range(R)]  # (TM,1)
    best = confs[0]
    for r in range(1, R):
        best = jnp.maximum(best, confs[r])
    out = jnp.zeros(out_ref.shape, jnp.float32)
    taken = jnp.zeros_like(best)
    for r in range(R):                                    # first max wins (torch argmax)
        sel = jnp.where((confs[r] >= best) & (taken < 0.5), 1.0, 0.0)
        out = out + sel * logp_ref[r]
        taken = taken + sel
    out_ref[...] = out


def aggregate(probs_all, logp_all, block_rows=256):
    R, T, Vp = logp_all.shape
    TM = min(block_rows, T)
    assert T % TM == 0
    return pl.pallas_call(
        _aggregate_kernel,
        out_shape=jax.ShapeDtypeStruct((T, Vp), jnp.float32),
        grid=(T // TM,),
        in_specs=[pl.BlockSpec((R, TM, Vp), lambda i: (0, i, 0)),
                  pl.BlockSpec((R, TM, Vp), lambda i: (0, i, 0))],
        out_specs=pl.BlockSpec((TM, Vp), lambda i: (i, 0)),
        compiler_params=pltpu.CompilerParams(dimension_semantics=("parallel",)),
    )(probs_all, logp_all)


# ----------------------------------------------------------------------------
# KWDesign_model forward (glue over the kernels)
# ----------------------------------------------------------------------------
def kwdesign_forward(batch, params, args, rng):
    B, N = batch["attention_mask"].shape
    T = B * N

    # MemoPiFold head -> pretrain_design {embeds, log_probs, probs}
    des, _logp0, probs0 = memo_pifold_forward(batch["h_V"], params["pifold"])

    # attention_mask is all-ones for this synthetic batch, so mask_select_feat
    # (torch.masked_select) is an identity reshape and is applied implicitly.
    keys = jax.random.split(rng, args.recycle_n)
    logp_list, probs_list = [], []
    prev_probs = probs0
    for i in range(args.recycle_n):
        p = params["tuning"][i]
        # fold the ESM embedding table into the tuning esm-projection: (VP, Dt)
        tw = jnp.dot(params["esm_table"][i], p["w1e"]).astype(jnp.bfloat16)
        gumbel = jax.random.gumbel(keys[i], (args.msa_n, T, VP), jnp.float32)
        des, logp_i, probs_i = recycle_forward(
            gumbel, prev_probs, des, tw, p, args.msa_n, args.temporature)
        logp_list.append(logp_i)
        probs_list.append(probs_i)
        prev_probs = probs_i

    logp_all = jnp.stack(logp_list, axis=0)        # (R, T, VP)
    probs_all = jnp.stack(probs_list, axis=0)      # (R, T, VP)
    log_probs = aggregate(probs_all, logp_all)[:, :V]

    outputs = {f"log_probs{i + 1}": logp_list[i][:, :V] for i in range(args.recycle_n)}
    outputs["log_probs"] = log_probs
    return outputs


# ----------------------------------------------------------------------------
# deterministic parameter init (weights bf16 for the MXU, biases f32,
# vocab heads padded 33 -> 128 with -1e9 bias on the padded lanes)
# ----------------------------------------------------------------------------
def _dense(key, din, dout):
    w = jax.random.normal(key, (din, dout), jnp.float32) / jnp.sqrt(float(din))
    b = jnp.zeros((1, dout), jnp.float32)
    return w, b


def _vocab_head(key, din):
    w, b = _dense(key, din, V)
    w_pad = jnp.zeros((din, VP), jnp.float32).at[:, :V].set(w)
    b_pad = jnp.full((1, VP), NEG, jnp.float32).at[:, :V].set(b)
    return w_pad.astype(jnp.bfloat16), b_pad


def init_params(key, args):
    Dd, De, Dt = args.input_design_dim, args.input_esm_dim, args.tunning_layers_dim
    keys = iter(jax.random.split(key, 2 + 5 * args.recycle_n))
    w0, b0 = _dense(next(keys), Dd, Dd)
    w1, b1 = _vocab_head(next(keys), Dd)
    params = {"pifold": {"w0": w0.astype(jnp.bfloat16), "b0": b0, "w1": w1, "b1": b1},
              "esm_table": [], "tuning": []}
    for i in range(args.recycle_n):
        table = jnp.zeros((VP, De), jnp.float32).at[:V].set(
            jax.random.normal(next(keys), (V, De), jnp.float32) * 0.1)
        params["esm_table"].append(table)          # rows >= V are zero (never selected)
        din_design = Dd if i == 0 else Dt
        w1d, _ = _dense(next(keys), din_design, Dt)
        w1e, b1t = _dense(next(keys), De, Dt)
        w2, b2 = _dense(next(keys), Dt, Dt)
        wout, bout = _vocab_head(next(keys), Dt)
        params["tuning"].append({
            "w1d": w1d.astype(jnp.bfloat16), "w1e": w1e, "b1": b1t,
            "w2": w2.astype(jnp.bfloat16), "b2": b2, "wout": wout, "bout": bout})
    return params


class Args:
    use_LM = True
    use_gearnet = False      # TODO(synk): GearNet structure-model path not implemented
    use_esmif = False        # TODO(synk): ESM-IF feature path not implemented
    recycle_n = 2
    msa_n = 2
    temporature = 1.0
    tunning_layers_n = 2
    tunning_layers_dim = 32
    input_design_dim = 32
    input_esm_dim = 32
    tunning_dropout = 0.1


if __name__ == "__main__":
    args = Args()
    B, N = 2, 16
    T = B * N

    key = jax.random.PRNGKey(0)
    k_hv, k_param, k_sample = jax.random.split(key, 3)

    batch = {
        "title": [f"protein_{b}" for b in range(B)],
        "h_V": jax.random.normal(k_hv, (T, args.input_design_dim), jnp.float32),
        "attention_mask": jnp.ones((B, N), jnp.float32),
        # TODO(synk): h_E / E_idx / batch_id / position feed only the GNN message-passing
        # and structure paths that are not ported; omitted from the synthetic batch.
    }

    params = init_params(k_param, args)
    outputs = kwdesign_forward(batch, params, args, k_sample)
    jax.block_until_ready(outputs["log_probs"])

    assert outputs["log_probs"].shape == (T, V)
    for i in range(args.recycle_n):
        assert outputs[f"log_probs{i + 1}"].shape == (T, V)
    assert bool(jnp.all(jnp.isfinite(outputs["log_probs"])))
    print("KERNEL_OK")
</pallas_src>

<mosaic_0001>
module attributes {stable_mosaic.version = 11 : i64} {
  func.func @_pifold_head_kernel(%arg0: i32, %arg1: memref<32x32xf32, #tpu.memory_space<vmem>>, %arg2: memref<32x32xbf16, #tpu.memory_space<vmem>>, %arg3: memref<1x32xf32, #tpu.memory_space<vmem>>, %arg4: memref<32x128xbf16, #tpu.memory_space<vmem>>, %arg5: memref<1x128xf32, #tpu.memory_space<vmem>>, %arg6: memref<32x32xf32, #tpu.memory_space<vmem>>, %arg7: memref<32x128xf32, #tpu.memory_space<vmem>>, %arg8: memref<32x128xf32, #tpu.memory_space<vmem>>) attributes {dimension_semantics = [#tpu.dimension_semantics<parallel>], iteration_bounds = array<i64: 1>, scalar_prefetch = 0 : i64, scratch_operands = 0 : i64, tpu.core_type = #tpu.core_type<tc>, window_params = [{transform_indices = @transform_0, window_bounds = array<i64: 32, 32>}, {pipeline_mode = #tpu.pipeline_mode<synchronous>, transform_indices = @transform_1, window_bounds = array<i64: 32, 32>}, {pipeline_mode = #tpu.pipeline_mode<synchronous>, transform_indices = @transform_2, window_bounds = array<i64: 1, 32>}, {pipeline_mode = #tpu.pipeline_mode<synchronous>, transform_indices = @transform_3, window_bounds = array<i64: 32, 128>}, {pipeline_mode = #tpu.pipeline_mode<synchronous>, transform_indices = @transform_4, window_bounds = array<i64: 1, 128>}, {transform_indices = @transform_5, window_bounds = array<i64: 32, 32>}, {transform_indices = @transform_6, window_bounds = array<i64: 32, 128>}, {transform_indices = @transform_7, window_bounds = array<i64: 32, 128>}]} {
    %c0 = arith.constant 0 : index
    %c0_0 = arith.constant 0 : index
    %0 = vector.load %arg1[%c0, %c0_0] : memref<32x32xf32, #tpu.memory_space<vmem>>, vector<32x32xf32>
    %1 = arith.truncf %0 : vector<32x32xf32> to vector<32x32xbf16>
    %c0_1 = arith.constant 0 : index
    %c0_2 = arith.constant 0 : index
    %2 = vector.load %arg2[%c0_1, %c0_2] : memref<32x32xbf16, #tpu.memory_space<vmem>>, vector<32x32xbf16>
    %cst = arith.constant dense<0.000000e+00> : vector<32x32xf32>
    %3 = tpu.matmul %1, %2, %cst {dimension_numbers = #tpu.dot_dimension_numbers<[1], [0], [0], [1], [0, 0, 1, 1], [], []>} : vector<32x32xbf16>, vector<32x32xbf16>, vector<32x32xf32> -> vector<32x32xf32>
    %c0_3 = arith.constant 0 : index
    %c0_4 = arith.constant 0 : index
    %4 = vector.load %arg3[%c0_3, %c0_4] : memref<1x32xf32, #tpu.memory_space<vmem>>, vector<1x32xf32>
    %5 = vector.broadcast %4 : vector<1x32xf32> to vector<32x32xf32>
    %6 = arith.addf %3, %5 : vector<32x32xf32>
    %cst_5 = arith.constant 0.000000e+00 : f32
    %7 = vector.broadcast %cst_5 : f32 to vector<32x32xf32>
    %8 = arith.maximumf %6, %7 : vector<32x32xf32>
    %c0_6 = arith.constant 0 : index
    %c0_7 = arith.constant 0 : index
    %9 = vector.load %arg6[%c0_6, %c0_7] : memref<32x32xf32, #tpu.memory_space<vmem>>, vector<32x32xf32>
    tpu.vector_store %arg6[%c0_6, %c0_7], %8 {strides = array<i32>} : memref<32x32xf32, #tpu.memory_space<vmem>>, vector<32x32xf32>,
    %10 = arith.truncf %8 : vector<32x32xf32> to vector<32x32xbf16>
    %c0_8 = arith.constant 0 : index
    %c0_9 = arith.constant 0 : index
    %11 = vector.load %arg4[%c0_8, %c0_9] : memref<32x128xbf16, #tpu.memory_space<vmem>>, vector<32x128xbf16>
    %cst_10 = arith.constant dense<0.000000e+00> : vector<32x128xf32>
    %12 = tpu.matmul %10, %11, %cst_10 {dimension_numbers = #tpu.dot_dimension_numbers<[1], [0], [0], [1], [0, 0, 1, 1], [], []>} : vector<32x32xbf16>, vector<32x128xbf16>, vector<32x128xf32> -> vector<32x128xf32>
    %c0_11 = arith.constant 0 : index
    %c0_12 = arith.constant 0 : index
    %13 = vector.load %arg5[%c0_11, %c0_12] : memref<1x128xf32, #tpu.memory_space<vmem>>, vector<1x128xf32>
    %14 = vector.broadcast %13 : vector<1x128xf32> to vector<32x128xf32>
    %15 = arith.addf %12, %14 : vector<32x128xf32>
    %cst_13 = arith.constant dense<0xFF800000> : vector<32xf32>
    %16 = vector.multi_reduction <maximumf>, %15, %cst_13 [1] : vector<32x128xf32> to vector<32xf32>
    %17 = vector.shape_cast %16 : vector<32xf32> to vector<32x1xf32>
    %18 = vector.broadcast %17 : vector<32x1xf32> to vector<32x128xf32>
    %19 = arith.subf %15, %18 : vector<32x128xf32>
    %20 = math.exp %19 : vector<32x128xf32>
    %cst_14 = arith.constant dense<0.000000e+00> : vector<32xf32>
    %21 = vector.multi_reduction <add>, %20, %cst_14 [1] : vector<32x128xf32> to vector<32xf32>
    %22 = vector.shape_cast %21 : vector<32xf32> to vector<32x1xf32>
    %23 = math.log %22 : vector<32x1xf32>
    %24 = arith.addf %23, %17 : vector<32x1xf32>
    %25 = vector.broadcast %24 : vector<32x1xf32> to vector<32x128xf32>
    %26 = arith.subf %15, %25 : vector<32x128xf32>
    %27 = vector.broadcast %22 : vector<32x1xf32> to vector<32x128xf32>
    %28 = arith.divf %20, %27 : vector<32x128xf32>
    %c0_15 = arith.constant 0 : index
    %c0_16 = arith.constant 0 : index
    %29 = vector.load %arg7[%c0_15, %c0_16] : memref<32x128xf32, #tpu.memory_space<vmem>>, vector<32x128xf32>
    tpu.vector_store %arg7[%c0_15, %c0_16], %26 {strides = array<i32>} : memref<32x128xf32, #tpu.memory_space<vmem>>, vector<32x128xf32>,
    %c0_17 = arith.constant 0 : index
    %c0_18 = arith.constant 0 : index
    %30 = vector.load %arg8[%c0_17, %c0_18] : memref<32x128xf32, #tpu.memory_space<vmem>>, vector<32x128xf32>
    tpu.vector_store %arg8[%c0_17, %c0_18], %28 {strides = array<i32>} : memref<32x128xf32, #tpu.memory_space<vmem>>, vector<32x128xf32>,
    return
  }
  func.func @transform_0(%arg0: i32) -> (i32, i32) {
    %c0_i32 = arith.constant 0 : i32
    %c0_i32_0 = arith.constant 0 : i32
    return %arg0, %c0_i32 : i32, i32
  }
  func.func @transform_1(%arg0: i32) -> (i32, i32) {
    %c0_i32 = arith.constant 0 : i32
    %c0_i32_0 = arith.constant 0 : i32
    %c0_i32_1 = arith.constant 0 : i32
    return %c0_i32, %c0_i32_0 : i32, i32
  }
  func.func @transform_2(%arg0: i32) -> (i32, i32) {
    %c0_i32 = arith.constant 0 : i32
    %c0_i32_0 = arith.constant 0 : i32
    %c0_i32_1 = arith.constant 0 : i32
    return %c0_i32, %c0_i32_0 : i32, i32
  }
  func.func @transform_3(%arg0: i32) -> (i32, i32) {
    %c0_i32 = arith.constant 0 : i32
    %c0_i32_0 = arith.constant 0 : i32
    %c0_i32_1 = arith.constant 0 : i32
    return %c0_i32, %c0_i32_0 : i32, i32
  }
  func.func @transform_4(%arg0: i32) -> (i32, i32) {
    %c0_i32 = arith.constant 0 : i32
    %c0_i32_0 = arith.constant 0 : i32
    %c0_i32_1 = arith.constant 0 : i32
    return %c0_i32, %c0_i32_0 : i32, i32
  }
  func.func @transform_5(%arg0: i32) -> (i32, i32) {
    %c0_i32 = arith.constant 0 : i32
    %c0_i32_0 = arith.constant 0 : i32
    return %arg0, %c0_i32 : i32, i32
  }
  func.func @transform_6(%arg0: i32) -> (i32, i32) {
    %c0_i32 = arith.constant 0 : i32
    %c0_i32_0 = arith.constant 0 : i32
    return %arg0, %c0_i32 : i32, i32
  }
  func.func @transform_7(%arg0: i32) -> (i32, i32) {
    %c0_i32 = arith.constant 0 : i32
    %c0_i32_0 = arith.constant 0 : i32
    return %arg0, %c0_i32 : i32, i32
  }
}

</mosaic_0001>

<bundles_post_ra>
// kernel: tpu_custom_call.1
= control target key start
LH: loop header
LB: loop body
LE: loop exit
PB: predicated region body
PF: predicated region fallthrough
CT: control target
= control target key end

     0   :  { %13 = vsyncpa [#allocation3], 0  ;;  %s692_s0 = inlined_call_operand.hbm [shape: f32[32,32], index: 0, kind: input, shape index: {}]   ;;  %s693_s1 = inlined_call_operand.hbm [shape: bf16[32,32], index: 1, kind: input, shape index: {}]   ;;  %s694_s2 = inlined_call_operand.vmem [shape: f32[1,32], index: 2, kind: input, shape index: {}]   ;;  %s695_s3 = inlined_call_operand.hbm [shape: bf16[32,128], index: 3, kind: input, shape index: {}]   ;;  %s696_s4 = inlined_call_operand.vmem [shape: f32[1,128], index: 4, kind: input, shape index: {}]   ;;  %s697_s5 = inlined_call_operand.hbm [shape: f32[32,32], index: 5, kind: output, shape index: {0}]   ;;  %s698_s6 = inlined_call_operand.hbm [shape: f32[32,128], index: 6, kind: output, shape index: {1}]   ;;  %s699_s7 = inlined_call_operand.hbm [shape: f32[32,128], index: 7, kind: output, shape index: {2}]  }
   0x1   :  { %14 = vsyncpa [#allocation6], 0 }
   0x2   :  { %15 = vsyncpa [#allocation4], 0  ;;  %s34_s26 = sshll.u32 %s693_s1, 4  ;;  %s35_s26 = int_to_ptr.hbm [resolvable:$true] %s34_s26 }
   0x3   :  { %16 = vsyncpa [#allocation10], 0  ;;  %s563_s27 = smov [#allocation5]   ;;  %s21_s8 = sshll.u32 %s692_s0, 4  ;;  %s22_s8 = int_to_ptr.hbm [resolvable:$true] %s21_s8 }
   0x4   :  { %s36_s28 = sshll.u32 %s563_s27, 4  ;;  %s564_s9 = smov 64   ;;  %s37_s28 = int_to_ptr.vmem [resolvable:$true] %s36_s28 }
   0x5   :  { %s565_s10 = smov 4   ;;  %s566_s11 = smov [#allocation2]  }
   0x6   :  { %42 = dma.hbm_to_vmem [thread:$0]  %s35_s26, 256, %s37_s28, [#allocation6], %s564_s9, %s564_s9, %s565_s10  }
   0x7   :  { %s23_s12 = sshll.u32 %s566_s11, 4  ;;  %s567_s13 = smov 128   ;;  %s24_s12 = int_to_ptr.vmem [resolvable:$true] %s23_s12 }
   0x8   :  { %s568_s14 = smov 8   ;;  %s49_s16 = sshll.u32 %s695_s3, 4  ;;  %s50_s16 = int_to_ptr.hbm [resolvable:$true] %s49_s16 }
   0x9   :  { %29 = dma.hbm_to_vmem [thread:$0]  %s22_s8, 512, %s24_s12, [#allocation3], %s567_s13, %s567_s13, %s568_s14  }
   0xa   :  { %s569_s17 = smov [#allocation7]  }
   0xb   :  { %s51_s0 = sshll.u32 %s569_s17, 4  ;;  %s52_s0 = int_to_ptr.vmem [resolvable:$true] %s51_s0 }
   0xc   :  { %57 = dma.hbm_to_vmem [thread:$0]  %s50_s16, 256, %s52_s0, [#allocation6], %s564_s9, %s564_s9, %s565_s10  }
   0xd   :  { %555 = dma.done.wait [#allocation3], 512  }
   0xe   :  { %556 = vsyncadd [#allocation3], 4294966784 }
   0xf   :  { %557 = dma.done.wait [#allocation6], 512  }
  0x10   :  { %558 = vsyncadd [#allocation6], 4294966784  ;;  %v368_v0 = vld [vmem:[#allocation5 + $0x8] sm:$0xff]  ;;  %v367_v1 = vld [vmem:[#allocation5] sm:$0xff]  ;;  %vm99_vm0 = vcmask 261120   ;;  %s298_s21 = sshll.u32 %s697_s5, 4  ;;  %s299_s21 = int_to_ptr.hbm [resolvable:$true] %s298_s21 }
  0x11   :  { %v73_v2 = vld [vmem:[#allocation2] sm:$0xff]  ;;  %v74_v3 = vld [vmem:[#allocation2 + $0x8] sm:$0xff]  ;;  %v75_v4 = vld [vmem:[#allocation2 + $0x10] sm:$0xff]  ;;  %112 = vmatpush.bf16.msra.mxu0 %v368_v0  ;;  %371 = vmatpush.bf16.msra.mxu2 %v368_v0  ;;  %s570_s22 = smov [#allocation8]   ;;  %s571_s5 = smov [#allocation9]  }
  0x12   :  { %v76_v5 = vld [vmem:[#allocation2 + $0x18] sm:$0xff]  ;;  %v77_v6 = vpack.c.bf16 %v74_v3, %v73_v2  ;;  %v369_v9 = vld [vmem:[#allocation7] sm:$0xff]  ;;  %v385_v10 = vld [vmem:[%s694_s2] ss:$0 sm:$0xff]  ;;  %s296_s23 = sshll.u32 %s570_s22, 4  ;;  %s309_s24 = sshll.u32 %s571_s5, 4  ;;  %s297_s23 = int_to_ptr.vmem [resolvable:$true] %s296_s23  ;;  %s310_s24 = int_to_ptr.vmem [resolvable:$true] %s309_s24 }
  0x13   :  { %v78_v7 = vpack.c.bf16 %v76_v5, %v75_v4  ;;  %v370_v8 = vld [vmem:[#allocation7 + $0x8] sm:$0xff]  ;;  %v386_v25 = vld [vmem:[%s696_s4] ss:$0 sm:$0xff]  ;;  %s311_s27 = sshll.u32 %s698_s6, 4  ;;  %s572_s6 = smov [#allocation11]   ;;  %s312_s27 = int_to_ptr.hbm [resolvable:$true] %s311_s27 }
  0x14   :  { %167 = vmatpush.bf16.msra.mxu1 %v370_v8  ;;  %373 = vmatpush.bf16.msra.mxu3 %v370_v8  ;;  %s322_s28 = sshll.u32 %s572_s6, 4  ;;  %s324_s8 = sshll.u32 %s699_s7, 4  ;;  %s323_s28 = int_to_ptr.vmem [resolvable:$true] %s322_s28  ;;  %s325_s8 = int_to_ptr.hbm [resolvable:$true] %s324_s8 }
  0x15   :  { %113 = vmatpush.bf16.msra.mxu0 %v367_v1  ;;  %372 = vmatpush.bf16.msra.mxu2 %v367_v1 }
  0x18   :  { %355 = vmatmul.msk.bf16.vlgmr.msra.gmra.mxu0 %vm99_vm0, %v77_v6  ;;  %356 = vmatmul.msk.bf16.vlgmr.msra.gmra.mxu2 %vm99_vm0, %v78_v7 }
  0x19   :  { %168 = vmatpush.bf16.msra.mxu1 %v369_v9  ;;  %374 = vmatpush.bf16.msra.mxu3 %v369_v9 }
  0x95   :  { %v115_v11 = vpop.f32.mrf.mxu0 }
  0x96   :  { %v116_v12 = vadd.f32 %v385_v10, %v115_v11 }
  0x98   :  { %v125_v13 = vmax.f32 %v116_v12, 0.0 }
  0x9a   :  { %129 = vst.msk [vmem:[#allocation8] sm:$0xff] %vm99_vm0, %v125_v13 }
  0x9b   :  { %v120_v14 = vpop.f32.mrf.mxu2 }
  0x9c   :  { %v121_v15 = vadd.f32 %v385_v10, %v120_v14 }
  0x9d   :  { %v117_v16 = vpop.f32.mrf.mxu0 }
  0x9e   :  { %v127_v17 = vmax.f32 %v121_v15, 0.0  ;;  %v118_v18 = vadd.f32 %v385_v10, %v117_v16 }
  0xa0   :  { %131 = vst.msk [vmem:[#allocation8 + $0x10] sm:$0xff] %vm99_vm0, %v127_v17  ;;  %v126_v19 = vmax.f32 %v118_v18, 0.0 }
  0xa2   :  { %130 = vst.msk [vmem:[#allocation8 + $0x8] sm:$0xff] %vm99_vm0, %v126_v19  ;;  %v133_v20 = vpack.c.bf16 %v126_v19, %v125_v13 }
  0xa3   :  { %v122_v21 = vpop.f32.mrf.mxu2 }
  0xa4   :  { %v123_v22 = vadd.f32 %v385_v10, %v122_v21  ;;  %365 = vmatmul.msk.bf16.vlgmr.msra.gmra.mxu1 %vm99_vm0, %v133_v20 }
  0xa6   :  { %v128_v23 = vmax.f32 %v123_v22, 0.0 }
  0xa8   :  { %132 = vst.msk [vmem:[#allocation8 + $0x18] sm:$0xff] %vm99_vm0, %v128_v23  ;;  %v134_v24 = vpack.c.bf16 %v128_v23, %v127_v17 }
  0xa9   :  { %304 = dma.vmem_to_hbm [thread:$0]  %s297_s23, 512, %s299_s21, [#allocation4], %s567_s13, %s567_s13, %s568_s14  }
  0xaa   :  { %366 = vmatmul.msk.bf16.vlgmr.msra.gmra.mxu3 %vm99_vm0, %v134_v24 }
 0x121   :  { %v170_v26 = vpop.f32.mrf.mxu1 }
 0x122   :  { %v171_v27 = vadd.f32 %v386_v25, %v170_v26 }
 0x124   :  { %180 = vmax.xlane.f32.xlu0 %v171_v27 }
 0x129   :  { %v172_v28 = vpop.f32.mrf.mxu1 }
 0x12a   :  { %v639_v29 = vadd.f32 %v386_v25, %v172_v28 }
 0x12c   :  { %182 = vmax.xlane.f32.xlu0 %v639_v29 }
 0x12d   :  { %v175_v30 = vpop.f32.mrf.mxu3 }
 0x12e   :  { %v642_v31 = vadd.f32 %v386_v25, %v175_v30 }
 0x130   :  { %184 = vmax.xlane.f32.xlu1 %v642_v31 }
 0x135   :  { %v177_v32 = vpop.f32.mrf.mxu3 }
 0x136   :  { %v645_v33 = vadd.f32 %v386_v25, %v177_v32 }
 0x138   :  { %186 = vmax.xlane.f32.xlu1 %v645_v33 }
 0x197   :  { %v181_v34 = vpop.xlane.xlu0 %180 }
 0x198   :  { %v188_v35 = vsub.f32 %v171_v27, %v181_v34 }
 0x19a   :  { %v192_v36 = vmul.f32 1.442695, %v188_v35 }
 0x19c   :  { %387 = vpow2.f32 %v192_v36 }
 0x19f   :  { %v183_v37 = vpop.xlane.xlu0 %182 }
 0x1a0   :  { %v189_v38 = vsub.f32 %v639_v29, %v183_v37 }
 0x1a2   :  { %v388_v39 = vpop.eup %387  ;;  %v194_v40 = vmul.f32 1.442695, %v189_v38 }
 0x1a3   :  { %v649_v41 = vpop.xlane.xlu1 %184  ;;  %200 = vadd.xlane.f32.xlu2 %v388_v39 }
 0x1a4   :  { %389 = vpow2.f32 %v194_v40  ;;  %v190_v42 = vsub.f32 %v642_v31, %v649_v41 }
 0x1a6   :  { %v196_v43 = vmul.f32 1.442695, %v190_v42 }
 0x1a8   :  { %391 = vpow2.f32 %v196_v43 }
 0x1aa   :  { %v653_v44 = vpop.eup %389 }
 0x1ab   :  { %v655_v45 = vpop.xlane.xlu1 %186  ;;  %202 = vadd.xlane.f32.xlu2 %v653_v44 }
 0x1ac   :  { %v191_v46 = vsub.f32 %v645_v33, %v655_v45 }
 0x1ae   :  { %v660_v47 = vpop.eup %391  ;;  %v198_v48 = vmul.f32 1.442695, %v191_v46 }
 0x1af   :  { %204 = vadd.xlane.f32.xlu0 %v660_v47 }
 0x1b0   :  { %393 = vpow2.f32 %v198_v48 }
 0x1b6   :  { %v663_v49 = vpop.eup %393 }
 0x1b7   :  { %206 = vadd.xlane.f32.xlu1 %v663_v49 }
 0x216   :  { %v201_v50 = vpop.xlane.xlu2 %200 }
 0x217   :  { %395 = vlog2.f32 %v201_v50  ;;  %v235_v58 = vand.u32 2147483648, %v201_v50  ;;  %v233_v62 = vand.u32 2147483647, %v201_v50  ;;  %vm229_vm2 = vweird.f32 %v201_v50 }
 0x218   :  { %397 = vrcp.f32 %v201_v50 }
 0x219   :  { %v236_v2 = vor.u32 1.1754944e-38, %v235_v58  ;;  %vm234_vm4 = vcmp.eq.f32.partialorder %v233_v62, 8.507059e+37 }
 0x21d   :  { %v396_v51 = vpop.eup %395 }
 0x21e   :  { %v398_v52 = vpop.eup %397  ;;  %v209_v53 = vmul.f32 0.6931472, %v396_v51  ;;  %v203_v54 = vpop.xlane.xlu2 %202 }
 0x21f   :  { %v225_v55 = vmul.f32 %v398_v52, %v201_v50  ;;  %399 = vlog2.f32 %v203_v54  ;;  %vm230_vm1 = vweird.f32 %v398_v52  ;;  %v248_v12 = vand.u32 2147483647, %v203_v54 }
 0x220   :  { %v216_v56 = vadd.f32 %v209_v53, %v181_v34  ;;  %401 = vrcp.f32 %v203_v54  ;;  %vm231_vm3 = vmor %vm229_vm2, %vm230_vm1  ;;  %v250_v13 = vand.u32 2147483648, %v203_v54  ;;  %vm244_vm6 = vweird.f32 %v203_v54 }
 0x221   :  { %v226_v57 = vsub.f32 1.0, %v225_v55  ;;  %vm249_vm8 = vcmp.eq.f32.partialorder %v248_v12, 8.507059e+37 }
 0x222   :  { %v205_v59 = vpop.xlane.xlu0 %204  ;;  %v220_v60 = vsub.f32 %v171_v27, %v216_v56  ;;  %v251_v22 = vor.u32 1.1754944e-38, %v250_v13 }
 0x223   :  { %v227_v61 = vmul.f32 %v398_v52, %v226_v57  ;;  %403 = vlog2.f32 %v205_v59  ;;  %v265_v23 = vand.u32 2147483648, %v205_v59  ;;  %v263_v27 = vand.u32 2147483647, %v205_v59 }
 0x224   :  { %405 = vrcp.f32 %v205_v59  ;;  %284 = vst [vmem:[#allocation9] sm:$0xff] %v220_v60  ;;  %vm259_vm10 = vweird.f32 %v205_v59 }
 0x225   :  { %v400_v63 = vpop.eup %399  ;;  %v228_v0 = vadd.f32 %v398_v52, %v227_v61  ;;  %v266_v35 = vor.u32 1.1754944e-38, %v265_v23  ;;  %vm264_vm12 = vcmp.eq.f32.partialorder %v263_v27, 8.507059e+37 }
 0x226   :  { %v402_v1 = vpop.eup %401  ;;  %v211_v3 = vmul.f32 0.6931472, %v400_v63 }
 0x227   :  { %v232_v4 = vsel %vm231_vm3, %v398_v52, %v228_v0  ;;  %v240_v5 = vmul.f32 %v402_v1, %v203_v54  ;;  %vm245_vm5 = vweird.f32 %v402_v1 }
 0x228   :  { %v237_v6 = vsel %vm234_vm4, %v236_v2, %v232_v4  ;;  %v217_v7 = vadd.f32 %v211_v3, %v183_v37  ;;  %vm246_vm7 = vmor %vm244_vm6, %vm245_vm5 }
 0x229   :  { %v404_v8 = vpop.eup %403  ;;  %v238_v9 = vmul.f32 %v388_v39, %v237_v6  ;;  %v241_v10 = vsub.f32 1.0, %v240_v5 }
 0x22a   :  { %v406_v11 = vpop.eup %405  ;;  %v213_v14 = vmul.f32 0.6931472, %v404_v8  ;;  %v207_v15 = vpop.xlane.xlu1 %206  ;;  %v221_v16 = vsub.f32 %v639_v29, %v217_v7 }
 0x22b   :  { %288 = vst [vmem:[#allocation11] sm:$0xff] %v238_v9  ;;  %v242_v17 = vmul.f32 %v402_v1, %v241_v10  ;;  %v255_v18 = vmul.f32 %v406_v11, %v205_v59  ;;  %407 = vlog2.f32 %v207_v15  ;;  %vm260_vm9 = vweird.f32 %v406_v11 }
 0x22c   :  { %v218_v19 = vadd.f32 %v213_v14, %v649_v41  ;;  %409 = vrcp.f32 %v207_v15  ;;  %285 = vst [vmem:[#allocation9 + $0x8] sm:$0xff] %v221_v16  ;;  %vm261_vm11 = vmor %vm259_vm10, %vm260_vm9  ;;  %v280_v42 = vand.u32 2147483648, %v207_v15  ;;  %v278_v46 = vand.u32 2147483647, %v207_v15 }
 0x22d   :  { %v243_v20 = vadd.f32 %v402_v1, %v242_v17  ;;  %v256_v21 = vsub.f32 1.0, %v255_v18  ;;  %vm274_vm14 = vweird.f32 %v207_v15 }
 0x22e   :  { %v222_v24 = vsub.f32 %v642_v31, %v218_v19  ;;  %vm279_vm0 = vcmp.eq.f32.partialorder %v278_v46, 8.507059e+37 }
 0x22f   :  { %v247_v25 = vsel %vm246_vm7, %v402_v1, %v243_v20  ;;  %v257_v26 = vmul.f32 %v406_v11, %v256_v21 }
 0x230   :  { %v252_v28 = vsel %vm249_vm8, %v251_v22, %v247_v25  ;;  %286 = vst [vmem:[#allocation9 + $0x10] sm:$0xff] %v222_v24 }
 0x231   :  { %v408_v29 = vpop.eup %407  ;;  %v253_v30 = vmul.f32 %v653_v44, %v252_v28  ;;  %v258_v32 = vadd.f32 %v406_v11, %v257_v26 }
 0x232   :  { %v410_v34 = vpop.eup %409  ;;  %v215_v36 = vmul.f32 0.6931472, %v408_v29 }
 0x233   :  { %289 = vst [vmem:[#allocation11 + $0x8] sm:$0xff] %v253_v30  ;;  %v262_v37 = vsel %vm261_vm11, %v406_v11, %v258_v32  ;;  %v270_v38 = vmul.f32 %v410_v34, %v207_v15  ;;  %vm275_vm13 = vweird.f32 %v410_v34 }
 0x234   :  { %v267_v31 = vsel %vm264_vm12, %v266_v35, %v262_v37  ;;  %v219_v39 = vadd.f32 %v215_v36, %v655_v45  ;;  %vm276_vm15 = vmor %vm274_vm14, %vm275_vm13  ;;  %v281_v45 = vor.u32 1.1754944e-38, %v280_v42 }
 0x235   :  { %v268_v40 = vmul.f32 %v660_v47, %v267_v31  ;;  %v271_v41 = vsub.f32 1.0, %v270_v38 }
 0x236   :  { %v223_v43 = vsub.f32 %v645_v33, %v219_v39 }
 0x237   :  { %290 = vst [vmem:[#allocation11 + $0x10] sm:$0xff] %v268_v40  ;;  %v272_v44 = vmul.f32 %v410_v34, %v271_v41 }
 0x238   :  { %287 = vst [vmem:[#allocation9 + $0x18] sm:$0xff] %v223_v43 }
 0x239   :  { %v273_v48 = vadd.f32 %v410_v34, %v272_v44  ;;  %317 = dma.vmem_to_hbm [thread:$0]  %s310_s24, 512, %s312_s27, [#allocation10], %s567_s13, %s567_s13, %s568_s14  }
 0x23b   :  { %v277_v33 = vsel %vm276_vm15, %v410_v34, %v273_v48 }
 0x23c   :  { %v282_v47 = vsel %vm279_vm0, %v281_v45, %v277_v33 }
 0x23d   :  { %v283_v50 = vmul.f32 %v663_v49, %v282_v47 }
 0x23f   :  { %291 = vst [vmem:[#allocation11 + $0x18] sm:$0xff] %v283_v50 }
 0x240   :  { %330 = dma.vmem_to_hbm [thread:$0]  %s323_s28, 512, %s325_s8, [#allocation10], %s567_s13, %s567_s13, %s568_s14  }
 0x241   :  { %559 = dma.done.wait [#allocation4], 512  }
 0x242   :  { %560 = vsyncadd [#allocation4], 4294966784 }
 0x243   :  { %561 = dma.done.wait [#allocation10], 1024  }
 0x244   :  { %562 = vsyncadd [#allocation10], 4294966272 }
 0x245   :  { %343 = vsyncpa [#allocation3], 1 }
 0x246   :  { %344 = vsyncpa [#allocation6], 1 }
 0x247   :  { %345 = vsyncpa [#allocation4], 1 }
 0x248   :  { %346 = vsyncpa [#allocation10], 1 }

</bundles_post_ra>
